<compile_context>
chip_gen: v6e
topology: v6e:2x2x1
jax: 0.10.0
libtpu: 0.0.40
codegen_flags: <defaults>
</compile_context>

<pallas_src>
import functools

import jax
import jax.numpy as jnp
from jax import lax
from jax.experimental import pallas as pl
from jax.experimental.pallas import tpu as pltpu


def _focal_pow(w, gamma):
    """(1 - pt) ** gamma; small integer gamma stays on the 4-wide VALU."""
    if float(gamma) == int(gamma) and 0 <= int(gamma) <= 8:
        g = int(gamma)
        if g == 0:
            return jnp.ones_like(w)
        r = w
        for _ in range(g - 1):
            r = r * w
        return r
    return w ** jnp.float32(gamma)          # non-integer gamma: EUP log+exp


def _focal_kernel(*refs, gamma, use_alpha):
    if use_alpha:
        x_ref, t_ref, a_ref, out_ref = refs
    else:
        x_ref, t_ref, out_ref = refs
        a_ref = None

    x = x_ref[0].astype(jnp.float32)            # (C, tn) classes on sublanes
    t = t_ref[0]                                # (1, tn) int32 targets

    # numerically-stable log-softmax along classes (sublane axis 0)
    m = jnp.max(x, axis=0, keepdims=True)       # (1, tn)
    z = x - m
    lse = jnp.log(jnp.sum(jnp.exp(z), axis=0, keepdims=True))
    logp = z - lse                              # (C, tn)

    # gather log-prob at the target class via one-hot; padded rows carry
    # target == C so their one-hot is all zeros -> logpt = 0 -> loss = 0.
    cls = lax.broadcasted_iota(jnp.int32, x.shape, 0)        # (C, tn)
    onehot = (cls == t).astype(jnp.float32)                  # (C, tn)
    logpt = jnp.sum(logp * onehot, axis=0, keepdims=True)    # (1, tn)
    pt = jnp.exp(logpt)

    if use_alpha:
        logpt = logpt * a_ref[0].astype(jnp.float32)         # (1, tn)

    loss = -_focal_pow(1.0 - pt, gamma) * logpt              # (1, tn)

    # distinct per-tile partial-sum output block -> safe under "parallel"
    out_ref[...] = jnp.sum(loss, keepdims=True)[None, None]  # (1,1,1,1)


def focal_loss(logits, target, *, gamma=2, alpha=None, size_average=True,
               tn=None):
    """Matches FocalLoss.forward: logits (N, C, *spatial) or (M, C)."""
    if logits.ndim > 2:
        n, c = logits.shape[0], logits.shape[1]
        x = logits.reshape(n, c, -1)            # (N, C, HW): free reshape only
    else:
        c = logits.shape[1]
        n = 1
        x = logits.T[None]                      # (1, C, M); C is the small axis
    hw = x.shape[2]
    t = target.reshape(n, hw).astype(jnp.int32)
    m_rows = n * hw

    # Tile size: lane-dense multiple of 128, sized so the double-buffered
    # logits block stays <= ~8 MiB (fits v5e's 16 MiB scoped-VMEM default and
    # v7x's 64 MiB physical VMEM with headroom).
    itemsize = jnp.dtype(x.dtype).itemsize
    if tn is None:
        budget = 8 * 1024 * 1024
        tn = max(128, min(2048, (budget // (2 * c * itemsize)) // 128 * 128))
    tn = int(max(128, min(tn, ((hw + 127) // 128) * 128)))
    hwp = ((hw + tn - 1) // tn) * tn
    pad = hwp - hw
    if pad:
        x = jnp.pad(x, ((0, 0), (0, 0), (0, pad)))
        t = jnp.pad(t, ((0, 0), (0, pad)), constant_values=c)  # class C => 0 loss

    inputs = [x, t[:, None, :]]                 # logits kept in native dtype
    in_specs = [
        pl.BlockSpec((1, c, tn), lambda i, j: (i, 0, j)),
        pl.BlockSpec((1, 1, tn), lambda i, j: (i, 0, j)),
    ]

    use_alpha = alpha is not None
    if use_alpha:
        if isinstance(alpha, (float, int)):
            assert c == 2, "scalar alpha implies binary classification"
            alpha_vec = jnp.array([alpha, 1.0 - alpha], jnp.float32)
        else:
            alpha_vec = jnp.asarray(alpha, jnp.float32).reshape(-1)
        # per-row alpha gathered in the wrapper (tiny (N, HWp) array); padded
        # rows use a clamped index but contribute zero loss regardless.
        at = alpha_vec[jnp.clip(t, 0, c - 1)][:, None, :]
        inputs.append(at)
        in_specs.append(pl.BlockSpec((1, 1, tn), lambda i, j: (i, 0, j)))

    nj = hwp // tn
    kernel = functools.partial(_focal_kernel, gamma=gamma, use_alpha=use_alpha)
    partials = pl.pallas_call(
        kernel,
        out_shape=jax.ShapeDtypeStruct((n, nj, 1, 1), jnp.float32),
        grid_spec=pltpu.PrefetchScalarGridSpec(
            num_scalar_prefetch=0,
            grid=(n, nj),
            in_specs=in_specs,
            out_specs=pl.BlockSpec((1, 1, 1, 1), lambda i, j: (i, j, 0, 0)),
        ),
        compiler_params=pltpu.CompilerParams(
            dimension_semantics=("parallel", "parallel")),
    )(*inputs)

    loss_sum = jnp.sum(partials)
    if size_average:
        return loss_sum / jnp.float32(m_rows)
    return loss_sum


def _focal_loss_ref(logits, target, gamma=2, alpha=None, size_average=True):
    n, c = logits.shape[0], logits.shape[1]
    x = logits.reshape(n, c, -1).transpose(0, 2, 1).reshape(-1, c)
    t = target.reshape(-1)
    logp = jax.nn.log_softmax(x.astype(jnp.float32), axis=1)
    logpt = jnp.take_along_axis(logp, t[:, None], axis=1)[:, 0]
    pt = jnp.exp(logpt)
    if alpha is not None:
        if isinstance(alpha, (float, int)):
            avec = jnp.array([alpha, 1.0 - alpha], jnp.float32)
        else:
            avec = jnp.asarray(alpha, jnp.float32)
        logpt = logpt * avec[t]
    loss = -1.0 * (1.0 - pt) ** gamma * logpt
    return loss.mean() if size_average else loss.sum()


if __name__ == "__main__":
    key = jax.random.PRNGKey(0)
    k1, k2 = jax.random.split(key)
    N, C, H, W = 2, 4, 16, 16
    logits = jax.random.normal(k1, (N, C, H, W), jnp.float32)
    target = jax.random.randint(k2, (N, H, W), 0, C, jnp.int32)

    # case 1: gamma=2, no alpha, mean reduction
    out1 = jax.block_until_ready(
        focal_loss(logits, target, gamma=2, alpha=None, size_average=True))
    ref1 = _focal_loss_ref(logits, target, gamma=2, alpha=None,
                           size_average=True)
    assert jnp.allclose(out1, ref1, rtol=1e-4, atol=1e-5), (out1, ref1)

    # case 2: gamma=2, per-class alpha, sum reduction
    alpha = [0.25, 0.3, 0.2, 0.25]
    out2 = jax.block_until_ready(
        focal_loss(logits, target, gamma=2, alpha=alpha, size_average=False))
    ref2 = _focal_loss_ref(logits, target, gamma=2, alpha=alpha,
                           size_average=False)
    assert jnp.allclose(out2, ref2, rtol=1e-4, atol=1e-4), (out2, ref2)

    print("KERNEL_OK")
</pallas_src>

<mosaic_0001>
module attributes {stable_mosaic.version = 11 : i64} {
  func.func @_focal_kernel(%arg0: i32, %arg1: i32, %arg2: memref<1x4x256xf32, #tpu.memory_space<vmem>>, %arg3: memref<1x1x256xi32, #tpu.memory_space<vmem>>, %arg4: memref<1x1x1x1xf32, #tpu.memory_space<vmem>>) attributes {dimension_semantics = [#tpu.dimension_semantics<parallel>, #tpu.dimension_semantics<parallel>], iteration_bounds = array<i64: 2, 1>, scalar_prefetch = 0 : i64, scratch_operands = 0 : i64, tpu.core_type = #tpu.core_type<tc>, window_params = [{transform_indices = @transform_0, window_bounds = array<i64: 1, 4, 256>}, {transform_indices = @transform_1, window_bounds = array<i64: 1, 1, 256>}, {transform_indices = @transform_2, window_bounds = array<i64: 1, 1, 1, 1>}]} {
    %c0 = arith.constant 0 : index
    %c0_0 = arith.constant 0 : index
    %c0_1 = arith.constant 0 : index
    %0 = vector.load %arg2[%c0, %c0_0, %c0_1] : memref<1x4x256xf32, #tpu.memory_space<vmem>>, vector<1x4x256xf32>
    %1 = vector.shape_cast %0 : vector<1x4x256xf32> to vector<4x256xf32>
    %c0_2 = arith.constant 0 : index
    %c0_3 = arith.constant 0 : index
    %c0_4 = arith.constant 0 : index
    %2 = vector.load %arg3[%c0_2, %c0_3, %c0_4] : memref<1x1x256xi32, #tpu.memory_space<vmem>>, vector<1x1x256xi32>
    %3 = vector.shape_cast %2 : vector<1x1x256xi32> to vector<1x256xi32>
    %cst = arith.constant dense<0xFF800000> : vector<256xf32>
    %4 = vector.multi_reduction <maximumf>, %1, %cst [0] : vector<4x256xf32> to vector<256xf32>
    %5 = vector.shape_cast %4 : vector<256xf32> to vector<1x256xf32>
    %6 = vector.broadcast %5 : vector<1x256xf32> to vector<4x256xf32>
    %7 = arith.subf %1, %6 : vector<4x256xf32>
    %8 = math.exp %7 : vector<4x256xf32>
    %cst_5 = arith.constant dense<0.000000e+00> : vector<256xf32>
    %9 = vector.multi_reduction <add>, %8, %cst_5 [0] : vector<4x256xf32> to vector<256xf32>
    %10 = vector.shape_cast %9 : vector<256xf32> to vector<1x256xf32>
    %11 = math.log %10 : vector<1x256xf32>
    %12 = vector.broadcast %11 : vector<1x256xf32> to vector<4x256xf32>
    %13 = arith.subf %7, %12 : vector<4x256xf32>
    %14 = tpu.iota {dimensions = array<i32: 0>} : vector<4x256xi32>
    %15 = vector.broadcast %3 : vector<1x256xi32> to vector<4x256xi32>
    %16 = arith.cmpi eq, %14, %15 : vector<4x256xi32>
    %17 = arith.extui %16 : vector<4x256xi1> to vector<4x256xi32>
    %18 = arith.sitofp %17 : vector<4x256xi32> to vector<4x256xf32>
    %19 = arith.mulf %13, %18 : vector<4x256xf32>
    %cst_6 = arith.constant dense<0.000000e+00> : vector<256xf32>
    %20 = vector.multi_reduction <add>, %19, %cst_6 [0] : vector<4x256xf32> to vector<256xf32>
    %21 = vector.shape_cast %20 : vector<256xf32> to vector<1x256xf32>
    %22 = math.exp %21 : vector<1x256xf32>
    %cst_7 = arith.constant 1.000000e+00 : f32
    %23 = vector.broadcast %cst_7 : f32 to vector<1x256xf32>
    %24 = arith.subf %23, %22 : vector<1x256xf32>
    %25 = arith.mulf %24, %24 : vector<1x256xf32>
    %cst_8 = arith.constant 0.000000e+00 : f32
    %26 = vector.broadcast %cst_8 : f32 to vector<1x256xf32>
    %27 = arith.subf %26, %25 : vector<1x256xf32>
    %28 = arith.mulf %27, %21 : vector<1x256xf32>
    %29 = vector.shape_cast %28 : vector<1x256xf32> to vector<1x1x256xf32>
    %cst_9 = arith.constant dense<0.000000e+00> : vector<1xf32>
    %30 = vector.multi_reduction <add>, %29, %cst_9 [1, 2] : vector<1x1x256xf32> to vector<1xf32>
    %31 = vector.shape_cast %30 : vector<1xf32> to vector<1x1x1xf32>
    %32 = vector.extract %31[0, 0, 0] : f32 from vector<1x1x1xf32>
    %33 = vector.broadcast %32 : f32 to vector<1x1xf32>
    %34 = vector.shape_cast %33 : vector<1x1xf32> to vector<1x1x1x1xf32>
    %c0_10 = arith.constant 0 : index
    %c0_11 = arith.constant 0 : index
    %c0_12 = arith.constant 0 : index
    %c0_13 = arith.constant 0 : index
    %35 = vector.load %arg4[%c0_10, %c0_11, %c0_12, %c0_13] : memref<1x1x1x1xf32, #tpu.memory_space<vmem>>, vector<1x1x1x1xf32>
    tpu.vector_store %arg4[%c0_10, %c0_11, %c0_12, %c0_13], %34 {strides = array<i32>} : memref<1x1x1x1xf32, #tpu.memory_space<vmem>>, vector<1x1x1x1xf32>,
    return
  }
  func.func @transform_0(%arg0: i32, %arg1: i32) -> (i32, i32, i32) {
    %c0_i32 = arith.constant 0 : i32
    %c0_i32_0 = arith.constant 0 : i32
    return %arg0, %c0_i32, %arg1 : i32, i32, i32
  }
  func.func @transform_1(%arg0: i32, %arg1: i32) -> (i32, i32, i32) {
    %c0_i32 = arith.constant 0 : i32
    %c0_i32_0 = arith.constant 0 : i32
    return %arg0, %c0_i32, %arg1 : i32, i32, i32
  }
  func.func @transform_2(%arg0: i32, %arg1: i32) -> (i32, i32, i32, i32) {
    %c0_i32 = arith.constant 0 : i32
    %c0_i32_0 = arith.constant 0 : i32
    %c0_i32_1 = arith.constant 0 : i32
    return %arg0, %arg1, %c0_i32, %c0_i32_0 : i32, i32, i32, i32
  }
}

</mosaic_0001>

<bundles_post_ra>
// kernel: tpu_custom_call.1
= control target key start
LH: loop header
LB: loop body
LE: loop exit
PB: predicated region body
PF: predicated region fallthrough
CT: control target
= control target key end

     0   :  { %7 = vsyncpa [#allocation3], 0  ;;  %s811_s0 = inlined_call_operand.hbm [shape: f32[2,4,256], index: 0, kind: input, shape index: {}]   ;;  %s812_s1 = inlined_call_operand.hbm [shape: s32[2,1,256], index: 1, kind: input, shape index: {}]   ;;  %s813_s2 = inlined_call_operand.vmem [shape: f32[2,1,1,1], index: 2, kind: output, shape index: {}]  }
   0x1   :  { %9 = vsyncpa [#allocation3 + $0x1], 0 }
   0x2   :  { %10 = vsyncpa [#allocation5], 0 }
   0x3   :  { %12 = vsyncpa [#allocation5 + $0x1], 0  ;;  %s674_s9 = smov 0   ;;  %s676_s10 = smov 0  }
   0x4   :  { %s678_s11 = smov 0   ;;  %s680_s12 = smov 0  }
   0x5   :  { %s682_s13 = smov 0   ;;  %s684_s14 = smov 0  }
   0x6 LB: > { %s451_s15 = sadd.s32 4294967295, %s654_s14   ;;  %s30_s16 = sadd.s32 1, %s650_s13  ;;  %s654_s14 = sphi %s684_s14, %s18_s14   ;;  %s650_s13 = sphi %s682_s13, %s822_s13   ;;  %s646_s12 = sphi %s680_s12, %s821_s12   ;;  %s642_s11 = sphi %s678_s11, %s820_s11   ;;  %s638_s10 = sphi %s676_s10, %s819_s10   ;;  %s634_s9 = sphi %s674_s9, %s818_s9  }
   0x7   : > { %p32_p0 = scmp.ge.s32.totalorder %s30_s16, 2  ;;  %s39_s17 = sadd.s32 1, %s642_s11 }
   0x8   : > { %p46_p1 = scmp.ne.s32.totalorder %s642_s11, %s638_s10  ;;  %p47_p2 = scmp.eq.s32.totalorder %s654_s14, 0 }
   0x9   : > { %s824_s16 = smov (%p32_p0, %s30_s16), 0  ;;  %p52_p4 = scmp.ne.s32.totalorder %s638_s10, %s634_s9 }
   0xa   : > { %p710_p3 = por %p47_p2, %p46_p1  ;;  %s34_s19 = ssub.s32 %s650_s13, %s824_s16 }
   0xb   : > { %p53_p5 = scmp.eq.s32.totalorder %s451_s15, 0  ;;  %p37_p6 = scmp.eq.s32.totalorder %s34_s19, 0 }
   0xc   : > { %p483_p8 = scmp.lt.s32.totalorder %s654_s14, 2  ;;  %s726_s22 = sand.u32 1, %s642_s11  }
   0xd   : > { %p717_p7 = por %p53_p5, %p52_p4  ;;  %s468_s23 = sshll.u32 %s650_s13, 7 }
   0xe   : > { %s723_s21 = scalar_select %p37_p6, %s642_s11, %s39_s17  }
   0xf   : > { %s455_s24 = sshll.u32 %s726_s22, 3  ;;  %s144_s27 = scalar_lea.hbm %s811_s0, %s468_s23 }
  0x10   : > { %s136_s28 = scalar_lea.vmem [#allocation2], %s455_s24  ;;  %p735_p9 = pnand %p483_p8, %p710_p3 }
  0x11   : > { %s146_s29 = sshll.u32 %s136_s28, 4  ;;  %p461_p10 = scmp.ge.s32.totalorder %s654_s14, 1  ;;  %s147_s29 = int_to_ptr.vmem [resolvable:$true] %s146_s29 }
  0x12   : > { %p172_p11 = scmp.lt.s32.totalorder %s654_s14, 3  ;;  %s133_s3 = scalar_lea.sflag [#allocation3], %s726_s22 }
  0x13   : > { %p546_p12 = pneg %p735_p9  ;;  %s557_s4 = scalar_lea.vmem %s147_s29, 128 }
  0x14   : > { %p558_p13 = scmp.ne.s32.totalorder %s147_s29, %s557_s4  ;;  %s656_s5 = smov [#allocation2]  }
  0x15   : > { %s562_s6 = sshll.u32 %s656_s5, 4  ;;  %s563_s6 = int_to_ptr.vmem [resolvable:$false] %s562_s6 }
  0x16   : > { %p560_p0 = pnand %p558_p13, %p546_p12  ;;  %s564_s7 = scalar_lea.vmem %s563_s6, 256 }
  0x17   : > { %p565_p2 = scmp.lt.s32.totalorder %s147_s29, %s563_s6  ;;  %p566_p3 = scmp.lt.s32.totalorder %s564_s7, %s557_s4 }
  0x18   : > { %p561_p1 = pneg %p560_p0 }
  0x19   : > { %p567_p4 = por %p566_p3, %p565_p2 }
  0x1b   : > { %p568_p5 = pnand %p567_p4, %p561_p1 }
  0x1d   : > { %571 = shalt.err (!%p568_p5)
}
  0x1e   : > { %479 = dma.hbm_to_vmem [thread:$0]  (!%p735_p9), %s144_s27, 128, %s147_s29, %s133_s3  }
  0x1f   : > { %p753_p6 = pnand %p461_p10, %p172_p11  ;;  %s458_s9 = sshll.u32 %s726_s22, 1 }
  0x20   : > { %s469_s15 = sshll.u32 %s650_s13, 5  ;;  %s157_s23 = scalar_lea.vmem [#allocation4], %s458_s9 }
  0x21   : > { %s165_s19 = scalar_lea.hbm %s812_s1, %s469_s15  ;;  %s167_s24 = sshll.u32 %s157_s23, 4  ;;  %s168_s24 = int_to_ptr.vmem [resolvable:$true] %s167_s24 }
  0x22   : > { %s154_s25 = scalar_lea.sflag [#allocation5], %s726_s22  ;;  %s585_s26 = scalar_lea.vmem %s168_s24, 32 }
  0x23   : > { %p586_p8 = scmp.ne.s32.totalorder %s168_s24, %s585_s26  ;;  %s657_s27 = smov [#allocation4]  }
  0x24   : > { %s590_s28 = sshll.u32 %s657_s27, 4  ;;  %s591_s28 = int_to_ptr.vmem [resolvable:$false] %s590_s28 }
  0x25   : > { %p588_p13 = pnand %p586_p8, %p546_p12  ;;  %s592_s29 = scalar_lea.vmem %s591_s28, 64 }
  0x26   : > { %p593_p10 = scmp.lt.s32.totalorder %s168_s24, %s591_s28  ;;  %p594_p11 = scmp.lt.s32.totalorder %s592_s29, %s585_s26 }
  0x27   : > { %p589_p0 = pneg %p588_p13 }
  0x28   : > { %p595_p1 = por %p594_p11, %p593_p10 }
  0x2a   : > { %p596_p2 = pnand %p595_p1, %p589_p0 }
  0x2c   : > { %599 = shalt.err (!%p596_p2)
}
  0x2d   : > { %482 = dma.hbm_to_vmem [thread:$0]  (!%p735_p9), %s165_s19, 32, %s168_s24, %s154_s25  }
  0x2e   : > { %176 = sbr.rel (%p753_p6) target bundleno = 372 (0x174), region = 28  ;;  %s178_s22 = sand.u32 (!%p753_p6), 1, %s638_s10  }
  0x2f   : > { %s462_s3 = sshll.u32 (!%p753_p6), %s178_s22, 3  ;;  %s179_s4 = scalar_lea.sflag (!%p753_p6), [#allocation3], %s178_s22 }
  0x30   : > { %s182_s5 = scalar_lea.vmem (!%p753_p6), [#allocation2], %s462_s3 }
  0x33   : > { %625 = dma.done.wait (%p717_p7), %s179_s4, 128  }
  0x34   : > { %627 = vsyncadd (%p717_p7), %s179_s4, 4294967168  ;;  %s463_s6 = sshll.u32 %s178_s22, 1  ;;  %s188_s7 = scalar_lea.sflag [#allocation5], %s178_s22 }
  0x35   : > { %s775_s9 = scalar_lea.vmem [#allocation4], %s463_s6 }
  0x36   : > { %629 = dma.done.wait (%p717_p7), %s188_s7, 32  }
  0x37   : > { %631 = vsyncadd (%p717_p7), %s188_s7, 4294967264  ;;  %vm231_vm0 = vcmask 1043456   ;;  %v226_v0 = vld [vmem:[%s182_s5] sm:$0xff]  ;;  %v279_v30 = vlaneseq  ;;  %v227_v39 = vld [vmem:[%s775_s9] sm:$0x3]  ;;  %v658_v45 = vmov 0.0  }
  0x38   : > { %v229_v1 = vcombine.high %v226_v0, %v226_v0  ;;  %v232_v2 = vsel %vm231_vm0, %v226_v0, -inf  ;;  %vm329_vm3 = vcmask 1040384   ;;  %p220_p7 = scmp.lt.s32.totalorder %s646_s12, 1  ;;  %vm343_vm4 = vcmask 0  }
  0x39   : > { %v233_v3 = vrot.slane %v232_v2, 4  ;;  %v280_v35 = vshrl.u32 %v279_v30, 7 }
  0x3a   : > { %v239_v4 = vsel %vm231_vm0, %v229_v1, -inf  ;;  %s826_s12 = smov (!%p220_p7, %s646_s12), 1 }
  0x3b   : > { %v234_v5 = vmax.f32 %v232_v2, %v233_v3  ;;  %v240_v6 = vrot.slane %v239_v4, 4  ;;  %v283_v37 = vsub.s32 0, %v280_v35  ;;  %v287_v38 = vsub.s32 1, %v280_v35  ;;  %s225_s8 = scalar_lea.vmem %s813_s2, %s826_s12 }
  0x3d   : > { %v235_v7 = vrot.slane %v234_v5, 2  ;;  %v241_v8 = vmax.f32 %v239_v4, %v240_v6  ;;  %v284_v40 = vrot.slane %v227_v39, %v283_v37  ;;  %v288_v41 = vrot.slane %v227_v39, %v287_v38 }
  0x3f   : > { %v236_v9 = vmax.f32 %v234_v5, %v235_v7  ;;  %v242_v10 = vrot.slane %v241_v8, 2  ;;  %vm289_vm1 = vcmp.eq.s32.totalorder %v280_v35, %v284_v40  ;;  %vm290_vm2 = vcmp.eq.s32.totalorder %v280_v35, %v288_v41 }
  0x40   : > { %v464_v46 = vsel %vm289_vm1, 1.0, %v658_v45  ;;  %v465_v47 = vsel %vm290_vm2, 1.0, %v658_v45 }
  0x41   : > { %v237_v11 = vrot.slane %v236_v9, 1  ;;  %v243_v12 = vmax.f32 %v241_v8, %v242_v10  ;;  %v297_v50 = vcombine.low %v464_v46, %v465_v47 }
  0x43   : > { %v238_v13 = vmax.f32 %v236_v9, %v237_v11  ;;  %v244_v14 = vrot.slane %v243_v12, 1 }
  0x45   : > { %v245_v15 = vmax.f32 %v243_v12, %v244_v14 }
  0x47   : > { %v248_v16 = vcombine.low %v238_v13, %v245_v15 }
  0x49   : > { %v250_v17 = vsub.f32 %v226_v0, %v248_v16 }
  0x4b   : > { %v251_v18 = vmul.f32 1.442695, %v250_v17 }
  0x4d   : > { %534 = vpow2.f32 %v251_v18 }
  0x5a   : > { %v535_v19 = vpop.eup %534 }
  0x5b   : > { %v254_v20 = vcombine.high %v535_v19, %v535_v19  ;;  %v256_v21 = vsel %vm231_vm0, %v535_v19, 0.0 }
  0x5c   : > { %v257_v22 = vrot.slane %v256_v21, 4 }
  0x5d   : > { %v263_v23 = vsel %vm231_vm0, %v254_v20, 0.0 }
  0x5e   : > { %v258_v24 = vadd.f32 %v257_v22, %v256_v21  ;;  %v264_v25 = vrot.slane %v263_v23, 4 }
  0x60   : > { %v259_v26 = vrot.slane %v258_v24, 2  ;;  %v265_v27 = vadd.f32 %v264_v25, %v263_v23 }
  0x62   : > { %v260_v28 = vadd.f32 %v259_v26, %v258_v24  ;;  %v266_v29 = vrot.slane %v265_v27, 2 }
  0x64   : > { %v261_v31 = vrot.slane %v260_v28, 1  ;;  %v267_v32 = vadd.f32 %v266_v29, %v265_v27 }
  0x66   : > { %v262_v33 = vadd.f32 %v261_v31, %v260_v28  ;;  %v268_v34 = vrot.slane %v267_v32, 1 }
  0x68   : > { %v269_v36 = vadd.f32 %v268_v34, %v267_v32  ;;  %536 = vlog2.f32 %v262_v33 }
  0x6a   : > { %538 = vlog2.f32 %v269_v36 }
  0x75   : > { %v537_v42 = vpop.eup %536 }
  0x76   : > { %v271_v43 = vmul.f32 0.6931472, %v537_v42 }
  0x77   : > { %v539_v44 = vpop.eup %538 }
  0x78   : > { %v273_v48 = vmul.f32 0.6931472, %v539_v44 }
  0x7a   : > { %v276_v49 = vcombine.low %v271_v43, %v273_v48 }
  0x7c   : > { %v278_v51 = vsub.f32 %v250_v17, %v276_v49 }
  0x7e   : > { %v299_v52 = vmul.f32 %v297_v50, %v278_v51 }
  0x80   : > { %v301_v53 = vcombine.high %v299_v52, %v299_v52  ;;  %v303_v54 = vsel %vm231_vm0, %v299_v52, 0.0 }
  0x81   : > { %v304_v55 = vrot.slane %v303_v54, 4 }
  0x82   : > { %v310_v56 = vsel %vm231_vm0, %v301_v53, 0.0 }
  0x83   : > { %v305_v57 = vadd.f32 %v304_v55, %v303_v54  ;;  %v311_v58 = vrot.slane %v310_v56, 4 }
  0x85   : > { %v306_v59 = vrot.slane %v305_v57, 2  ;;  %v312_v60 = vadd.f32 %v311_v58, %v310_v56 }
  0x87   : > { %v307_v61 = vadd.f32 %v306_v59, %v305_v57  ;;  %v313_v62 = vrot.slane %v312_v60, 2 }
  0x89   : > { %v308_v63 = vrot.slane %v307_v61, 1  ;;  %v314_v0 = vadd.f32 %v313_v62, %v312_v60 }
  0x8b   : > { %v309_v1 = vadd.f32 %v308_v63, %v307_v61  ;;  %v315_v2 = vrot.slane %v314_v0, 1 }
  0x8d   : > { %v316_v3 = vadd.f32 %v315_v2, %v314_v0  ;;  %v317_v4 = vmul.f32 1.442695, %v309_v1 }
  0x8f   : > { %540 = vpow2.f32 %v317_v4  ;;  %v319_v5 = vmul.f32 1.442695, %v316_v3 }
  0x91   : > { %542 = vpow2.f32 %v319_v5 }
  0x9c   : > { %v541_v6 = vpop.eup %540 }
  0x9d   : > { %v321_v7 = vsub.f32 1.0, %v541_v6 }
  0x9e   : > { %v543_v8 = vpop.eup %542 }
  0x9f   : > { %v322_v9 = vsub.f32 1.0, %v543_v8  ;;  %v323_v10 = vmul.f32 %v321_v7, %v321_v7 }
  0xa1   : > { %v324_v11 = vmul.f32 %v322_v9, %v322_v9  ;;  %v325_v12 = vsub.f32 0.0, %v323_v10 }
  0xa3   : > { %v326_v13 = vsub.f32 0.0, %v324_v11  ;;  %v327_v14 = vmul.f32 %v325_v12, %v309_v1 }
  0xa5   : > { %v328_v15 = vmul.f32 %v326_v13, %v316_v3  ;;  %v330_v16 = vsel %vm329_vm3, %v327_v14, 0.0 }
  0xa7   : > { %v331_v17 = vsel %vm329_vm3, %v328_v15, 0.0 }
  0xa8   : > { %v332_v18 = vadd.f32 %v331_v17, %v330_v16 }
  0xaa   : > { %333 = vadd.xlane.f32.xlu0 %v332_v18 }
 0x133   : > { %v334_v19 = vpop.xlane.xlu0 %333 }
 0x134   : > { %v335_v20 = vrot.slane %v334_v19, 4 }
 0x136   : > { %v336_v21 = vadd.f32 %v335_v20, %v334_v19 }
 0x138   : > { %v337_v22 = vrot.slane %v336_v21, 2 }
 0x13a   : > { %v338_v23 = vadd.f32 %v337_v22, %v336_v21 }
 0x13c   : > { %v339_v24 = vrot.slane %v338_v23, 1 }
 0x13e   : > { %v340_v25 = vadd.f32 %v339_v24, %v338_v23 }
 0x140   : > { %470 = vpush %v340_v25 }
 0x171   : > { %s471_s15 = spop %470 }
 0x172   : > { %v342_v26 = vstv %s471_s15 }
 0x173   : > { %344 = vst.msk [vmem:[%s225_s8] sm:$0x1] %vm343_vm4, %v342_v26 }
 0x174 PF: > { %s18_s14 = sadd.s32 1, %s654_s14   ;;  %s818_s9 = smov %s638_s10 }
 0x175   : > { %p15_p9 = scmp.ge.s32.totalorder %s18_s14, 4   ;;  %s819_s10 = smov %s642_s11 }
 0x176   : > { %s820_s11 = smov %s723_s21  ;;  %s821_s12 = smov %s650_s13 }
 0x177   : > { %s822_s13 = smov %s824_s16  ;;  %17 = sbr.rel (!%p15_p9) target bundleno = 6 (0x6), region = 81 }
 0x17c   :  { %368 = vsyncpa [#allocation3], 1 }
 0x17d   :  { %370 = vsyncpa [#allocation3 + $0x1], 1 }
 0x17e   :  { %371 = vsyncpa [#allocation5], 1 }
 0x17f   :  { %373 = vsyncpa [#allocation5 + $0x1], 1 }

</bundles_post_ra>
